<compile_context>
chip_gen: v7x
topology: tpu7x:2x2x1
jax: 0.10.0
libtpu: 0.0.40
codegen_flags: <defaults>
</compile_context>

<pallas_src>
import numpy as np
import jax
import jax.numpy as jnp
from jax.experimental import pallas as pl
from jax.experimental.pallas import tpu as pltpu


# ----------------------------------------------------------------------------
# RRC filter construction (time_vector / rrc_filter_v2 equivalents, in numpy).
# The exact rrc_filter_v2 source is not given; we use the standard root-raised
# cosine impulse response, normalized to unit energy for numerical sanity.
# ----------------------------------------------------------------------------
SYMBOL_RATE = 100e9
T_SYM = 1.0 / SYMBOL_RATE
ROLL_OFF = 0.3
SPS = 8
N_T = 4


def time_vector(sps, T, n_T=4):
    n = 2 * n_T * sps + 1                      # 65 taps
    return np.linspace(-n_T * T, n_T * T, n)


def rrc_filter_v2(t, T, roll_off=0.3):
    beta = roll_off
    h = np.zeros_like(t)
    for i, ti in enumerate(t):
        if abs(ti) < 1e-20:
            h[i] = (1.0 / T) * (1.0 + beta * (4.0 / np.pi - 1.0))
        elif beta > 0 and abs(abs(ti) - T / (4.0 * beta)) < 1e-20 * T:
            h[i] = (beta / (T * np.sqrt(2.0))) * (
                (1.0 + 2.0 / np.pi) * np.sin(np.pi / (4.0 * beta))
                + (1.0 - 2.0 / np.pi) * np.cos(np.pi / (4.0 * beta))
            )
        else:
            tt = ti / T
            num = np.sin(np.pi * tt * (1.0 - beta)) + 4.0 * beta * tt * np.cos(
                np.pi * tt * (1.0 + beta)
            )
            den = np.pi * tt * (1.0 - (4.0 * beta * tt) ** 2)
            h[i] = (1.0 / T) * num / den
    h = h / np.sqrt(np.sum(h ** 2))            # unit-energy normalization
    return h


t_vec = time_vector(SPS, T_SYM, n_T=N_T)
g_np = rrc_filter_v2(t_vec, T_SYM, roll_off=ROLL_OFF)          # (65,)
L = g_np.shape[0]

K = L + 7          # compact per-symbol window width (8 overlapping length-L windows)


# ----------------------------------------------------------------------------
# Host-side (numpy) fused parameter build, in TRANSPOSED form:
#   conv 'valid' + reshape(-1,8) + Linear1 ==  win @ (Gc @ W1.T)
#   kernel computes everything transposed, so store
#     W1_eff^T = W1 @ Gc.T        (H_pad8, K)
#     W2                          (C_pad8, H_pad8)
# ----------------------------------------------------------------------------
def _pad8(n):
    return max(8, ((n + 7) // 8) * 8)


def build_fused_params(W1, b1, W2, b2):
    W1 = np.asarray(W1, np.float32)
    b1 = np.asarray(b1, np.float32)
    W2 = np.asarray(W2, np.float32)
    b2 = np.asarray(b2, np.float32)
    H, C = W1.shape[0], W2.shape[0]
    H_SUB, C_SUB = _pad8(H), _pad8(C)

    g_rev = g_np[::-1].astype(np.float32)       # np.convolve flips the filter
    Gc = np.zeros((K, 8), np.float32)           # compact shifted-filter matrix
    for j in range(8):
        Gc[j:j + L, j] = g_rev

    w1T = np.zeros((H_SUB, K), np.float32)
    w1T[:H, :] = W1 @ Gc.T                      # fused (conv + Linear1), transposed
    b1T = np.zeros((H_SUB, 1), np.float32)
    b1T[:H, 0] = b1
    w2T = np.zeros((C_SUB, H_SUB), np.float32)
    w2T[:C, :H] = W2
    b2T = np.zeros((C_SUB, 1), np.float32)
    b2T[:C, 0] = b2

    return (jnp.asarray(w1T), jnp.asarray(b1T),
            jnp.asarray(w2T), jnp.asarray(b2T))


# ----------------------------------------------------------------------------
# Pallas kernel (transposed): h^T = tanh(W1_eff^T @ win^T + b1),
#                             out^T = W2 @ h^T + b2.
# All feature dims are sublane dims; symbols live on lanes (lane-dense I/O).
# ----------------------------------------------------------------------------
def decdown_kernel(winT_ref, w1T_ref, b1_ref, w2T_ref, b2_ref, outT_ref):
    hT = jnp.tanh(
        jnp.dot(w1T_ref[...], winT_ref[...].astype(w1T_ref.dtype),
                preferred_element_type=jnp.float32) + b1_ref[...])
    outT_ref[...] = (
        jnp.dot(w2T_ref[...], hT.astype(w2T_ref.dtype),
                preferred_element_type=jnp.float32) + b2_ref[...])


def _tensorcores_per_chip():
    # v7x has 2 TensorCores per chip; v5e / v6e have 1.
    try:
        kind = jax.devices()[0].device_kind.lower()
    except Exception:
        return 1
    return 2 if ("v7" in kind or "7x" in kind) else 1


def decdown_forward(x, w1T, b1T, w2T, b2T, classes, *, tm=None, use_bf16=False):
    """x: (N,) signal, N = 8*M + L - 1.  Returns (M, classes) float32 logits."""
    H_SUB, K_ = w1T.shape
    C_SUB = w2T.shape[0]
    assert K_ == K

    n_valid = x.shape[0] - L + 1
    assert n_valid % 8 == 0, "valid-conv length must be divisible by 8"
    M = n_valid // 8

    # ---- per-generation tile sizing (lanes = symbols) ----------------------
    if tm is None:
        n_tc = _tensorcores_per_chip()
        # v5e/v6e: one big tile for small M (avoid per-step grid overhead);
        # v7x: at least 2 tiles so both TensorCores get work; cap at 2048.
        tm = min(2048, max(128, pl.cdiv(M, n_tc)))
    tm = max(128, min(tm, max(128, M)))
    tm = ((tm + 127) // 128) * 128              # lane-dense tiles
    M_pad = pl.cdiv(M, tm) * tm

    # ---- window construction: one small transpose + 9 shifted slices -------
    # win^T[8s + j, m] = x[8(m+s) + j]   (no gather, no lane padding of K)
    n_need = 8 * (M_pad + 8)
    x32 = x.astype(jnp.float32)
    x_pad = jnp.pad(x32, (0, n_need - x32.shape[0]))
    XrT = x_pad.reshape(M_pad + 8, 8).T                             # (8, M_pad+8)
    winT = jnp.concatenate([XrT[:, s:s + M_pad] for s in range(9)], axis=0)  # (72, M_pad)
    if use_bf16:
        winT = winT.astype(jnp.bfloat16)
        w1T = w1T.astype(jnp.bfloat16)
        w2T = w2T.astype(jnp.bfloat16)

    grid = (M_pad // tm,)
    outT = pl.pallas_call(
        decdown_kernel,
        out_shape=jax.ShapeDtypeStruct((C_SUB, M_pad), jnp.float32),
        grid=grid,
        in_specs=[
            pl.BlockSpec((K, tm), lambda i: (0, i)),        # win^T: tiled over symbols
            pl.BlockSpec((H_SUB, K), lambda i: (0, 0)),     # fused W1^T: VMEM-resident
            pl.BlockSpec((H_SUB, 1), lambda i: (0, 0)),
            pl.BlockSpec((C_SUB, H_SUB), lambda i: (0, 0)),
            pl.BlockSpec((C_SUB, 1), lambda i: (0, 0)),
        ],
        out_specs=pl.BlockSpec((C_SUB, tm), lambda i: (0, i)),   # (8, tm): 16x less writeback
        compiler_params=pltpu.CompilerParams(
            dimension_semantics=("parallel",),              # shard tiles across TCs (v7x)
            vmem_limit_bytes=32 * 1024 * 1024),
    )(winT, w1T, b1T, w2T, b2T)

    return outT[:classes, :M].T                              # (M, classes)


# ----------------------------------------------------------------------------
# main
# ----------------------------------------------------------------------------
if __name__ == "__main__":
    hidden_nodes = 32
    classes = 4

    key = jax.random.PRNGKey(0)
    k_x, k_w1, k_b1, k_w2, k_b2 = jax.random.split(key, 5)

    # deterministic parameter init (PyTorch-style uniform +/- 1/sqrt(fan_in))
    lim1 = 1.0 / np.sqrt(8.0)
    lim2 = 1.0 / np.sqrt(float(hidden_nodes))
    W1 = jax.random.uniform(k_w1, (hidden_nodes, 8), jnp.float32, -lim1, lim1)
    b1 = jax.random.uniform(k_b1, (hidden_nodes,), jnp.float32, -lim1, lim1)
    W2 = jax.random.uniform(k_w2, (classes, hidden_nodes), jnp.float32, -lim2, lim2)
    b2 = jax.random.uniform(k_b2, (classes,), jnp.float32, -lim2, lim2)

    # input 1-D signal: 1024 symbols
    M_sym = 1024
    N = 8 * M_sym + L - 1
    x = jax.random.normal(k_x, (N,), jnp.float32)

    w1T, b1T, w2T, b2T = build_fused_params(W1, b1, W2, b2)

    fwd = jax.jit(lambda sig, a, b, c, d: decdown_forward(sig, a, b, c, d, classes))
    out = fwd(x, w1T, b1T, w2T, b2T)
    out = jax.block_until_ready(out)

    # reference check (plain numpy, mirrors the PyTorch forward, in f32)
    x_np = np.asarray(x, np.float32)
    conv_ref = np.convolve(x_np, g_np.astype(np.float32), mode="valid").reshape(-1, 8)
    h_ref = np.tanh(conv_ref @ np.asarray(W1).T + np.asarray(b1))
    out_ref = h_ref @ np.asarray(W2).T + np.asarray(b2)
    assert out.shape == (M_sym, classes)
    np.testing.assert_allclose(np.asarray(out), out_ref, rtol=2e-3, atol=2e-3)

    print("KERNEL_OK")
</pallas_src>

<mosaic_0001>
module attributes {stable_mosaic.version = 11 : i64} {
  func.func @decdown_kernel(%arg0: i32, %arg1: memref<72x1024xf32, #tpu.memory_space<vmem>>, %arg2: memref<32x72xf32, #tpu.memory_space<vmem>>, %arg3: memref<32x1xf32, #tpu.memory_space<vmem>>, %arg4: memref<8x32xf32, #tpu.memory_space<vmem>>, %arg5: memref<8x1xf32, #tpu.memory_space<vmem>>, %arg6: memref<8x1024xf32, #tpu.memory_space<vmem>>) attributes {dimension_semantics = [#tpu.dimension_semantics<parallel>], iteration_bounds = array<i64: 1>, scalar_prefetch = 0 : i64, scratch_operands = 0 : i64, tpu.core_type = #tpu.core_type<tc>, window_params = [{transform_indices = @transform_0, window_bounds = array<i64: 72, 1024>}, {pipeline_mode = #tpu.pipeline_mode<synchronous>, transform_indices = @transform_1, window_bounds = array<i64: 32, 72>}, {pipeline_mode = #tpu.pipeline_mode<synchronous>, transform_indices = @transform_2, window_bounds = array<i64: 32, 1>}, {pipeline_mode = #tpu.pipeline_mode<synchronous>, transform_indices = @transform_3, window_bounds = array<i64: 8, 32>}, {pipeline_mode = #tpu.pipeline_mode<synchronous>, transform_indices = @transform_4, window_bounds = array<i64: 8, 1>}, {transform_indices = @transform_5, window_bounds = array<i64: 8, 1024>}]} {
    %c0 = arith.constant 0 : index
    %c0_0 = arith.constant 0 : index
    %0 = vector.load %arg2[%c0, %c0_0] : memref<32x72xf32, #tpu.memory_space<vmem>>, vector<32x72xf32>
    %c0_1 = arith.constant 0 : index
    %c0_2 = arith.constant 0 : index
    %1 = vector.load %arg1[%c0_1, %c0_2] : memref<72x1024xf32, #tpu.memory_space<vmem>>, vector<72x1024xf32>
    %cst = arith.constant dense<0.000000e+00> : vector<32x1024xf32>
    %2 = tpu.matmul %0, %1, %cst {dimension_numbers = #tpu.dot_dimension_numbers<[1], [0], [0], [1], [0, 0, 1, 1], [], []>} : vector<32x72xf32>, vector<72x1024xf32>, vector<32x1024xf32> -> vector<32x1024xf32>
    %c0_3 = arith.constant 0 : index
    %c0_4 = arith.constant 0 : index
    %3 = vector.load %arg3[%c0_3, %c0_4] : memref<32x1xf32, #tpu.memory_space<vmem>>, vector<32x1xf32>
    %4 = vector.broadcast %3 : vector<32x1xf32> to vector<32x1024xf32>
    %5 = arith.addf %2, %4 : vector<32x1024xf32>
    %6 = math.tanh %5 : vector<32x1024xf32>
    %c0_5 = arith.constant 0 : index
    %c0_6 = arith.constant 0 : index
    %7 = vector.load %arg4[%c0_5, %c0_6] : memref<8x32xf32, #tpu.memory_space<vmem>>, vector<8x32xf32>
    %cst_7 = arith.constant dense<0.000000e+00> : vector<8x1024xf32>
    %8 = tpu.matmul %7, %6, %cst_7 {dimension_numbers = #tpu.dot_dimension_numbers<[1], [0], [0], [1], [0, 0, 1, 1], [], []>} : vector<8x32xf32>, vector<32x1024xf32>, vector<8x1024xf32> -> vector<8x1024xf32>
    %c0_8 = arith.constant 0 : index
    %c0_9 = arith.constant 0 : index
    %9 = vector.load %arg5[%c0_8, %c0_9] : memref<8x1xf32, #tpu.memory_space<vmem>>, vector<8x1xf32>
    %10 = vector.broadcast %9 : vector<8x1xf32> to vector<8x1024xf32>
    %11 = arith.addf %8, %10 : vector<8x1024xf32>
    %c0_10 = arith.constant 0 : index
    %c0_11 = arith.constant 0 : index
    %12 = vector.load %arg6[%c0_10, %c0_11] : memref<8x1024xf32, #tpu.memory_space<vmem>>, vector<8x1024xf32>
    tpu.vector_store %arg6[%c0_10, %c0_11], %11 {strides = array<i32>} : memref<8x1024xf32, #tpu.memory_space<vmem>>, vector<8x1024xf32>,
    return
  }
  func.func @transform_0(%arg0: i32) -> (i32, i32) {
    %c0_i32 = arith.constant 0 : i32
    %c0_i32_0 = arith.constant 0 : i32
    return %c0_i32, %arg0 : i32, i32
  }
  func.func @transform_1(%arg0: i32) -> (i32, i32) {
    %c0_i32 = arith.constant 0 : i32
    %c0_i32_0 = arith.constant 0 : i32
    %c0_i32_1 = arith.constant 0 : i32
    return %c0_i32, %c0_i32_0 : i32, i32
  }
  func.func @transform_2(%arg0: i32) -> (i32, i32) {
    %c0_i32 = arith.constant 0 : i32
    %c0_i32_0 = arith.constant 0 : i32
    %c0_i32_1 = arith.constant 0 : i32
    return %c0_i32, %c0_i32_0 : i32, i32
  }
  func.func @transform_3(%arg0: i32) -> (i32, i32) {
    %c0_i32 = arith.constant 0 : i32
    %c0_i32_0 = arith.constant 0 : i32
    %c0_i32_1 = arith.constant 0 : i32
    return %c0_i32, %c0_i32_0 : i32, i32
  }
  func.func @transform_4(%arg0: i32) -> (i32, i32) {
    %c0_i32 = arith.constant 0 : i32
    %c0_i32_0 = arith.constant 0 : i32
    %c0_i32_1 = arith.constant 0 : i32
    return %c0_i32, %c0_i32_0 : i32, i32
  }
  func.func @transform_5(%arg0: i32) -> (i32, i32) {
    %c0_i32 = arith.constant 0 : i32
    %c0_i32_0 = arith.constant 0 : i32
    return %c0_i32, %arg0 : i32, i32
  }
}

</mosaic_0001>

<bundles_post_ra>
// kernel: _lambda_.1
= control target key start
LH: loop header
LB: loop body
LE: loop exit
PB: predicated region body
PF: predicated region fallthrough
CT: control target
= control target key end

     0   :  { %v1012_v3 = vmov 0.0   ;;  %v1013_v8 = vmov 0   ;;  %vm120_vm0 = vcmask 588800   ;;  %vm528_vm1 = vcmask 261120   ;;  %s1412_s0 = inlined_call_operand.vmem [shape: f32[72,1024], index: 0, kind: input, shape index: {}]   ;;  %s1413_s1 = inlined_call_operand.vmem [shape: f32[32,72], index: 1, kind: input, shape index: {}]   ;;  %s1414_s2 = inlined_call_operand.vmem [shape: f32[32,1], index: 2, kind: input, shape index: {}]   ;;  %s1415_s4 = inlined_call_operand.vmem [shape: f32[8,1], index: 4, kind: input, shape index: {}]   ;;  %s1416_s3 = inlined_call_operand.vmem [shape: f32[8,32], index: 3, kind: input, shape index: {}]   ;;  %s1417_s5 = inlined_call_operand.vmem [shape: f32[8,1024], index: 5, kind: output, shape index: {}]  }
   0x1   :  { %v25_v0 = vld [vmem:[%s1412_s0 + $0x8] sm:$0xff]  ;;  %v27_v2 = vld [vmem:[%s1412_s0 + $0x18] sm:$0xff]  ;;  %197 = vmatprep.mubr.f32.mxu0 %v1012_v3  ;;  %286 = vmatprep.mubr.f32.mxu1 %v1012_v3  ;;  %v24_v6 = vld [vmem:[%s1412_s0] sm:$0xff] }
   0x2   :  { %v33_v1 = vld [vmem:[%s1412_s0 + $0x48] sm:$0xff]  ;;  %v35_v5 = vld [vmem:[%s1412_s0 + $0x58] sm:$0xff]  ;;  %v32_v7 = vld [vmem:[%s1412_s0 + $0x40] sm:$0xff]  ;;  %946 = vset.pattern.permute.xlu0 %v1013_v8  ;;  %947 = vset.pattern.permute.xlu1 %v1013_v8 }
   0x3   :  { %v848_v4 = vpack.c.bf16 %v33_v1, %v25_v0  ;;  %v864_v9 = vpack.c.bf16 %v35_v5, %v27_v2  ;;  %v850_v10 = vpack.c.bf16 %v32_v7, %v24_v6  ;;  %v26_v11 = vld [vmem:[%s1412_s0 + $0x10] sm:$0xff]  ;;  %v41_v13 = vld [vmem:[%s1412_s0 + $0x88] sm:$0xff]  ;;  %v43_v16 = vld [vmem:[%s1412_s0 + $0x98] sm:$0xff] }
   0x4   :  { %v34_v12 = vld [vmem:[%s1412_s0 + $0x50] sm:$0xff]  ;;  %v49_v15 = vld [vmem:[%s1412_s0 + $0xc8] sm:$0xff]  ;;  %v51_v17 = vld [vmem:[%s1412_s0 + $0xd8] sm:$0xff] }
   0x5   :  { %849 = vmatprep.subr.bf16.mxu0 %v848_v4  ;;  %v866_v14 = vpack.c.bf16 %v34_v12, %v26_v11  ;;  %865 = vmatprep.subr.bf16.mxu1 %v864_v9  ;;  %v852_v18 = vpack.c.bf16 %v49_v15, %v41_v13  ;;  %v868_v19 = vpack.c.bf16 %v51_v17, %v43_v16  ;;  %v40_v20 = vld [vmem:[%s1412_s0 + $0x80] sm:$0xff]  ;;  %v42_v22 = vld [vmem:[%s1412_s0 + $0x90] sm:$0xff]  ;;  %v57_v25 = vld [vmem:[%s1412_s0 + $0x108] sm:$0xff] }
   0x6   :  { %851 = vmatpush1.bf16.msra.mxu0 %v850_v10  ;;  %v48_v21 = vld [vmem:[%s1412_s0 + $0xc0] sm:$0xff]  ;;  %v50_v24 = vld [vmem:[%s1412_s0 + $0xd0] sm:$0xff]  ;;  %v65_v26 = vld [vmem:[%s1412_s0 + $0x148] sm:$0xff] }
   0x7   :  { %867 = vmatpush1.bf16.msra.mxu1 %v866_v14  ;;  %v854_v23 = vpack.c.bf16 %v48_v21, %v40_v20  ;;  %853 = vmatprep.subr.bf16.mxu0 %v852_v18  ;;  %v870_v27 = vpack.c.bf16 %v50_v24, %v42_v22  ;;  %v856_v28 = vpack.c.bf16 %v65_v26, %v57_v25  ;;  %v59_v29 = vld [vmem:[%s1412_s0 + $0x118] sm:$0xff]  ;;  %v56_v31 = vld [vmem:[%s1412_s0 + $0x100] sm:$0xff]  ;;  %v58_v34 = vld [vmem:[%s1412_s0 + $0x110] sm:$0xff] }
   0x8   :  { %869 = vmatprep.subr.bf16.mxu1 %v868_v19  ;;  %v67_v30 = vld [vmem:[%s1412_s0 + $0x158] sm:$0xff]  ;;  %v64_v33 = vld [vmem:[%s1412_s0 + $0x140] sm:$0xff]  ;;  %v66_v35 = vld [vmem:[%s1412_s0 + $0x150] sm:$0xff] }
   0x9   :  { %v872_v32 = vpack.c.bf16 %v67_v30, %v59_v29  ;;  %v858_v36 = vpack.c.bf16 %v64_v33, %v56_v31  ;;  %v73_v37 = vld [vmem:[%s1412_s0 + $0x188] sm:$0xff]  ;;  %v75_v39 = vld [vmem:[%s1412_s0 + $0x198] sm:$0xff]  ;;  %v874_v40 = vpack.c.bf16 %v66_v35, %v58_v34  ;;  %v72_v43 = vld [vmem:[%s1412_s0 + $0x180] sm:$0xff] }
   0xa   :  { %855 = vmatpush1.bf16.msra.mxu0 %v854_v23  ;;  %v81_v38 = vld [vmem:[%s1412_s0 + $0x1c8] sm:$0xff]  ;;  %v83_v42 = vld [vmem:[%s1412_s0 + $0x1d8] sm:$0xff]  ;;  %v80_v44 = vld [vmem:[%s1412_s0 + $0x1c0] sm:$0xff] }
   0xb   :  { %871 = vmatpush1.bf16.msra.mxu1 %v870_v27  ;;  %857 = vmatprep.subr.bf16.mxu0 %v856_v28  ;;  %v860_v41 = vpack.c.bf16 %v81_v38, %v73_v37  ;;  %v876_v45 = vpack.c.bf16 %v83_v42, %v75_v39  ;;  %v74_v46 = vld [vmem:[%s1412_s0 + $0x190] sm:$0xff]  ;;  %v862_v48 = vpack.c.bf16 %v80_v44, %v72_v43  ;;  %v89_v50 = vld [vmem:[%s1412_s0 + $0x208] sm:$0xff]  ;;  %v91_v51 = vld [vmem:[%s1412_s0 + $0x218] sm:$0xff] }
   0xc   :  { %873 = vmatprep.subr.bf16.mxu1 %v872_v32  ;;  %v82_v47 = vld [vmem:[%s1412_s0 + $0x1d0] sm:$0xff]  ;;  %v29_v52 = vld [vmem:[%s1412_s0 + $0x28] sm:$0xff]  ;;  %v31_v54 = vld [vmem:[%s1412_s0 + $0x38] sm:$0xff] }
   0xd   :  { %v878_v49 = vpack.c.bf16 %v82_v47, %v74_v46  ;;  %v37_v53 = vld [vmem:[%s1412_s0 + $0x68] sm:$0xff]  ;;  %v39_v55 = vld [vmem:[%s1412_s0 + $0x78] sm:$0xff]  ;;  %v28_v56 = vld [vmem:[%s1412_s0 + $0x20] sm:$0xff] }
   0xe   :  { %859 = vmatpush1.bf16.msra.mxu0 %v858_v36  ;;  %v36_v57 = vld [vmem:[%s1412_s0 + $0x60] sm:$0xff]  ;;  %v30_v59 = vld [vmem:[%s1412_s0 + $0x30] sm:$0xff]  ;;  %v880_v63 = vpack.c.bf16 %v37_v53, %v29_v52  ;;  %v896_v0 = vpack.c.bf16 %v39_v55, %v31_v54  ;;  %v45_v2 = vld [vmem:[%s1412_s0 + $0xa8] sm:$0xff] }
   0xf   :  { %875 = vmatpush1.bf16.msra.mxu1 %v874_v40  ;;  %861 = vmatprep.subr.bf16.mxu0 %v860_v41  ;;  %v88_v58 = vld [vmem:[%s1412_s0 + $0x200] sm:$0xff]  ;;  %v38_v60 = vld [vmem:[%s1412_s0 + $0x70] sm:$0xff]  ;;  %v882_v1 = vpack.c.bf16 %v36_v57, %v28_v56  ;;  %v53_v4 = vld [vmem:[%s1412_s0 + $0xe8] sm:$0xff] }
  0x10   :  { %877 = vmatprep.subr.bf16.mxu1 %v876_v45  ;;  %v90_v61 = vld [vmem:[%s1412_s0 + $0x210] sm:$0xff]  ;;  %v1181_v62 = vld [vmem:[%s1413_s1] sm:$0xff]  ;;  %v47_v5 = vld [vmem:[%s1412_s0 + $0xb8] sm:$0xff]  ;;  %v898_v6 = vpack.c.bf16 %v38_v60, %v30_v59  ;;  %v884_v13 = vpack.c.bf16 %v53_v4, %v45_v2 }
  0x11   :  { %v55_v7 = vld [vmem:[%s1412_s0 + $0xf8] sm:$0xff]  ;;  %v44_v8 = vld [vmem:[%s1412_s0 + $0xa0] sm:$0xff]  ;;  %v46_v10 = vld [vmem:[%s1412_s0 + $0xb0] sm:$0xff] }
  0x12   :  { %863 = vmatpush1.bf16.msra.mxu0 %v862_v48  ;;  %v52_v9 = vld [vmem:[%s1412_s0 + $0xe0] sm:$0xff]  ;;  %v54_v11 = vld [vmem:[%s1412_s0 + $0xf0] sm:$0xff]  ;;  %v1214_v12 = vld [vmem:[%s1413_s1 + $0x8] sm:$0xff]  ;;  %v900_v14 = vpack.c.bf16 %v55_v7, %v47_v5 }
  0x13   :  { %879 = vmatpush1.bf16.msra.mxu1 %v878_v49  ;;  %149 = vmatprep.subr.mxu0 %v89_v50  ;;  %v886_v15 = vpack.c.bf16 %v52_v9, %v44_v8  ;;  %v61_v16 = vld [vmem:[%s1412_s0 + $0x128] sm:$0xff]  ;;  %v63_v18 = vld [vmem:[%s1412_s0 + $0x138] sm:$0xff]  ;;  %v902_v19 = vpack.c.bf16 %v54_v11, %v46_v10  ;;  %v60_v21 = vld [vmem:[%s1412_s0 + $0x120] sm:$0xff] }
  0x14   :  { %238 = vmatprep.subr.mxu1 %v91_v51  ;;  %v69_v17 = vld [vmem:[%s1412_s0 + $0x168] sm:$0xff]  ;;  %v71_v20 = vld [vmem:[%s1412_s0 + $0x178] sm:$0xff]  ;;  %v68_v22 = vld [vmem:[%s1412_s0 + $0x160] sm:$0xff] }
  0x15   :  { %v62_v23 = vld [vmem:[%s1412_s0 + $0x130] sm:$0xff]  ;;  %v888_v26 = vpack.c.bf16 %v69_v17, %v61_v16  ;;  %v904_v27 = vpack.c.bf16 %v71_v20, %v63_v18  ;;  %v890_v28 = vpack.c.bf16 %v68_v22, %v60_v21  ;;  %v77_v29 = vld [vmem:[%s1412_s0 + $0x1a8] sm:$0xff]  ;;  %v79_v31 = vld [vmem:[%s1412_s0 + $0x1b8] sm:$0xff] }
  0x16   :  { %150 = vmatpush1.msra.mxu0 %v88_v58  ;;  %v70_v24 = vld [vmem:[%s1412_s0 + $0x170] sm:$0xff]  ;;  %v85_v30 = vld [vmem:[%s1412_s0 + $0x1e8] sm:$0xff]  ;;  %v87_v33 = vld [vmem:[%s1412_s0 + $0x1f8] sm:$0xff] }
  0x17   :  { %239 = vmatpush1.msra.mxu1 %v90_v61  ;;  %828 = vmatmul.mubr.msk.f32.vlgmr.msra.gmra.mrb[0].mxu0 %vm120_vm0, %v1181_v62  ;;  %v1249_v25 = vld [vmem:[%s1413_s1 + $0x10] sm:$0xff]  ;;  %v906_v32 = vpack.c.bf16 %v70_v24, %v62_v23  ;;  %v76_v34 = vld [vmem:[%s1412_s0 + $0x1a0] sm:$0xff]  ;;  %v23_v38 = vld [vmem:[%s1413_s1 + $0x18] sm:$0xff]  ;;  %v892_v39 = vpack.c.bf16 %v85_v30, %v77_v29  ;;  %v908_v40 = vpack.c.bf16 %v87_v33, %v79_v31 }
  0x18   :  { %832 = vmatmul.mubr.msk.f32.vlgmr.msra.gmra.mrb[0].mxu1 %vm120_vm0, %v1181_v62  ;;  %881 = vmatprep.subr.bf16.mxu0 %v880_v63  ;;  %v84_v35 = vld [vmem:[%s1412_s0 + $0x1e0] sm:$0xff]  ;;  %v78_v36 = vld [vmem:[%s1412_s0 + $0x1b0] sm:$0xff]  ;;  %v93_v43 = vld [vmem:[%s1412_s0 + $0x228] sm:$0xff] }
  0x19   :  { %897 = vmatprep.subr.bf16.mxu1 %v896_v0  ;;  %883 = vmatpush1.bf16.msra.mxu0 %v882_v1  ;;  %v86_v37 = vld [vmem:[%s1412_s0 + $0x1f0] sm:$0xff]  ;;  %v894_v41 = vpack.c.bf16 %v84_v35, %v76_v34  ;;  %v95_v44 = vld [vmem:[%s1412_s0 + $0x238] sm:$0xff]  ;;  %v96_v45 = vld [vmem:[%s1414_s2] sm:$0xff] }
  0x1a   :  { %899 = vmatpush1.bf16.msra.mxu1 %v898_v6  ;;  %203 = vmatprep.mubr.f32.mxu0 %v1012_v3  ;;  %v910_v42 = vpack.c.bf16 %v86_v37, %v78_v36  ;;  %v92_v46 = vld [vmem:[%s1412_s0 + $0x220] sm:$0xff]  ;;  %v98_v47 = vld [vmem:[%s1414_s2 + $0x10] sm:$0xff]  ;;  %v97_v49 = vld [vmem:[%s1414_s2 + $0x8] sm:$0xff] }
  0x1b   :  { %292 = vmatprep.mubr.f32.mxu1 %v1012_v3  ;;  %829 = vmatmul.mubr.msk.f32.gmra.mrb[2].mxu0 %vm120_vm0, %v1214_v12  ;;  %v94_v48 = vld [vmem:[%s1412_s0 + $0x230] sm:$0xff]  ;;  %v99_v50 = vld [vmem:[%s1414_s2 + $0x18] sm:$0xff]  ;;  %v522_v51 = vld [vmem:[%s1415_s4] sm:$0xff] }
  0x1c   :  { %833 = vmatmul.mubr.msk.f32.gmra.mrb[2].mxu1 %vm120_vm0, %v1214_v12  ;;  %885 = vmatprep.subr.bf16.mxu0 %v884_v13 }
  0x1d   :  { %901 = vmatprep.subr.bf16.mxu1 %v900_v14  ;;  %887 = vmatpush1.bf16.msra.mxu0 %v886_v15 }
  0x1e   :  { %903 = vmatpush1.bf16.msra.mxu1 %v902_v19  ;;  %209 = vmatprep.mubr.f32.mxu0 %v1012_v3 }
  0x1f   :  { %298 = vmatprep.mubr.f32.mxu1 %v1012_v3  ;;  %830 = vmatmul.mubr.msk.f32.gmra.mrb[4].mxu0 %vm120_vm0, %v1249_v25 }
  0x20   :  { %834 = vmatmul.mubr.msk.f32.gmra.mrb[4].mxu1 %vm120_vm0, %v1249_v25  ;;  %889 = vmatprep.subr.bf16.mxu0 %v888_v26 }
  0x21   :  { %905 = vmatprep.subr.bf16.mxu1 %v904_v27  ;;  %891 = vmatpush1.bf16.msra.mxu0 %v890_v28 }
  0x22   :  { %907 = vmatpush1.bf16.msra.mxu1 %v906_v32  ;;  %215 = vmatprep.mubr.f32.mxu0 %v1012_v3 }
  0x23   :  { %304 = vmatprep.mubr.f32.mxu1 %v1012_v3  ;;  %831 = vmatmul.mubr.msk.f32.gmra.mrb[6].mxu0 %vm120_vm0, %v23_v38 }
  0x24   :  { %835 = vmatmul.mubr.msk.f32.gmra.mrb[6].mxu1 %vm120_vm0, %v23_v38  ;;  %893 = vmatprep.subr.bf16.mxu0 %v892_v39 }
  0x25   :  { %909 = vmatprep.subr.bf16.mxu1 %v908_v40  ;;  %895 = vmatpush1.bf16.msra.mxu0 %v894_v41 }
  0x26   :  { %911 = vmatpush1.bf16.msra.mxu1 %v910_v42  ;;  %327 = vmatprep.subr.mxu0 %v93_v43 }
  0x27   :  { %416 = vmatprep.subr.mxu1 %v95_v44  ;;  %375 = vmatprep.mubr.f32.mxu0 %v1012_v3 }
  0x28   :  { %464 = vmatprep.mubr.f32.mxu1 %v1012_v3  ;;  %102 = vperm.xlu0 %946, %v96_v45  }
  0x29   :  { %328 = vmatpush1.msra.mxu0 %v92_v46  ;;  %112 = vperm.xlu1 %947, %v98_v47  }
  0x2a   :  { %417 = vmatpush1.msra.mxu1 %v94_v48  ;;  %836 = vmatmul.mubr.msk.f32.vlgmr.msra.gmra.mrb[8].mxu0 %vm120_vm0, %v1181_v62 }
  0x2b   :  { %840 = vmatmul.mubr.msk.f32.vlgmr.msra.gmra.mrb[8].mxu1 %vm120_vm0, %v1181_v62  ;;  %381 = vmatprep.mubr.f32.mxu0 %v1012_v3 }
  0x2c   :  { %470 = vmatprep.mubr.f32.mxu1 %v1012_v3  ;;  %107 = vperm.xlu0 %946, %v97_v49  }
  0x2d   :  { %117 = vperm.xlu1 %947, %v99_v50  }
  0x2e   :  { %837 = vmatmul.mubr.msk.f32.gmra.mrb[10].mxu0 %vm120_vm0, %v1214_v12 }
  0x2f   :  { %841 = vmatmul.mubr.msk.f32.gmra.mrb[10].mxu1 %vm120_vm0, %v1214_v12  ;;  %387 = vmatprep.mubr.f32.mxu0 %v1012_v3 }
  0x30   :  { %476 = vmatprep.mubr.f32.mxu1 %v1012_v3  ;;  %525 = vperm.xlu0 %946, %v522_v51  }
  0x32   :  { %838 = vmatmul.mubr.msk.f32.gmra.mrb[12].mxu0 %vm120_vm0, %v1249_v25 }
  0x33   :  { %842 = vmatmul.mubr.msk.f32.gmra.mrb[12].mxu1 %vm120_vm0, %v1249_v25  ;;  %393 = vmatprep.mubr.f32.mxu0 %v1012_v3 }
  0x34   :  { %482 = vmatprep.mubr.f32.mxu1 %v1012_v3 }
  0x36   :  { %839 = vmatmul.mubr.msk.f32.gmra.mrb[14].mxu0 %vm120_vm0, %v23_v38 }
  0x37   :  { %843 = vmatmul.mubr.msk.f32.gmra.mrb[14].mxu1 %vm120_vm0, %v23_v38  ;;  %596 = vmatprep.mubr.f32.mxu0 %v1012_v3 }
  0x38   :  { %667 = vmatprep.mubr.f32.mxu1 %v1012_v3 }
  0xa7   :  { %v1339_v52 = vpop.permute.xlu0 %102 }
  0xa8   :  { %v1347_v63 = vpop.permute.xlu1 %112 }
  0xab   :  { %v1344_v60 = vpop.permute.xlu0 %107 }
  0xac   :  { %v1356_v15 = vpop.permute.xlu1 %117 }
  0xea   :  { %v199_v53 = vpop.f32.mrb[0].mxu0 }
  0xeb   :  { %v200_v54 = vadd.f32 %v199_v53, %v1339_v52  ;;  %v288_v55 = vpop.f32.mrb[0].mxu1  ;;  %v201_v56 = vpop.f32.mrb[1].mxu0 }
  0xec   :  { %v289_v57 = vadd.f32 %v288_v55, %v1339_v52  ;;  %v202_v58 = vadd.f32 %v201_v56, %v1339_v52  ;;  %v290_v59 = vpop.f32.mrb[1].mxu1 }
  0xed   :  { %948 = vtanh.f32 %v200_v54  ;;  %v291_v61 = vadd.f32 %v290_v59, %v1339_v52 }
  0xee   :  { %950 = vtanh.f32 %v289_v57  ;;  %v205_v62 = vpop.f32.mrb[2].mxu0 }
  0xef   :  { %952 = vtanh.f32 %v202_v58  ;;  %v206_v0 = vadd.f32 %v205_v62, %v1344_v60  ;;  %v294_v1 = vpop.f32.mrb[2].mxu1  ;;  %v207_v2 = vpop.f32.mrb[3].mxu0 }
  0xf0   :  { %954 = vtanh.f32 %v291_v61  ;;  %v295_v4 = vadd.f32 %v294_v1, %v1344_v60  ;;  %v208_v5 = vadd.f32 %v207_v2, %v1344_v60  ;;  %v296_v6 = vpop.f32.mrb[3].mxu1 }
  0xf1   :  { %956 = vtanh.f32 %v206_v0  ;;  %v297_v7 = vadd.f32 %v296_v6, %v1344_v60 }
  0xf2   :  { %958 = vtanh.f32 %v295_v4  ;;  %v211_v8 = vpop.f32.mrb[4].mxu0 }
  0xf3   :  { %960 = vtanh.f32 %v208_v5  ;;  %v212_v9 = vadd.f32 %v211_v8, %v1347_v63  ;;  %v300_v10 = vpop.f32.mrb[4].mxu1  ;;  %v213_v11 = vpop.f32.mrb[5].mxu0 }
  0xf4   :  { %962 = vtanh.f32 %v297_v7  ;;  %v301_v12 = vadd.f32 %v300_v10, %v1347_v63  ;;  %v214_v13 = vadd.f32 %v213_v11, %v1347_v63  ;;  %v302_v14 = vpop.f32.mrb[5].mxu1 }
  0xf5   :  { %964 = vtanh.f32 %v212_v9  ;;  %v303_v16 = vadd.f32 %v302_v14, %v1347_v63 }
  0xf6   :  { %966 = vtanh.f32 %v301_v12  ;;  %v217_v17 = vpop.f32.mrb[6].mxu0  ;;  %v521_v12 = vld [vmem:[%s1416_s3] sm:$0xff] }
  0xf7   :  { %v949_v18 = vpop.eup %948  ;;  %968 = vtanh.f32 %v214_v13  ;;  %v218_v19 = vadd.f32 %v217_v17, %v1356_v15  ;;  %v306_v20 = vpop.f32.mrb[6].mxu1 }
  0xf8   :  { %v219_v21 = vpop.f32.mrb[7].mxu0  ;;  %v951_v22 = vpop.eup %950  ;;  %970 = vtanh.f32 %v303_v16  ;;  %v307_v23 = vadd.f32 %v306_v20, %v1356_v15 }
  0xf9   :  { %v220_v24 = vadd.f32 %v219_v21, %v1356_v15  ;;  %v308_v25 = vpop.f32.mrb[7].mxu1  ;;  %v953_v26 = vpop.eup %952  ;;  %972 = vtanh.f32 %v218_v19 }
  0xfa   :  { %v309_v27 = vadd.f32 %v308_v25, %v1356_v15  ;;  %v955_v28 = vpop.eup %954  ;;  %974 = vtanh.f32 %v307_v23 }
  0xfb   :  { %v957_v29 = vpop.eup %956  ;;  %976 = vtanh.f32 %v220_v24 }
  0xfc   :  { %v959_v30 = vpop.eup %958  ;;  %978 = vtanh.f32 %v309_v27  ;;  %v914_v31 = vpack.c.bf16 %v957_v29, %v949_v18 }
  0xfd   :  { %v961_v32 = vpop.eup %960  ;;  %v377_v33 = vpop.f32.mrb[8].mxu0  ;;  %v922_v34 = vpack.c.bf16 %v959_v30, %v951_v22 }
  0xfe   :  { %v963_v35 = vpop.eup %962  ;;  %v378_v36 = vadd.f32 %v377_v33, %v1339_v52  ;;  %v466_v37 = vpop.f32.mrb[8].mxu1  ;;  %v912_v39 = vpack.c.bf16 %v961_v32, %v953_v26 }
  0xff   :  { %v379_v38 = vpop.f32.mrb[9].mxu0  ;;  %v965_v40 = vpop.eup %964  ;;  %v467_v41 = vadd.f32 %v466_v37, %v1339_v52  ;;  %v920_v44 = vpack.c.bf16 %v963_v35, %v955_v28 }
 0x100   :  { %v380_v42 = vadd.f32 %v379_v38, %v1339_v52  ;;  %v468_v43 = vpop.f32.mrb[9].mxu1  ;;  %v967_v45 = vpop.eup %966  ;;  %980 = vtanh.f32 %v378_v36  ;;  %913 = vmatprep.subr.bf16.mxu0 %v912_v39 }
 0x101   :  { %v469_v46 = vadd.f32 %v468_v43, %v1339_v52  ;;  %v969_v47 = vpop.eup %968  ;;  %982 = vtanh.f32 %v467_v41  ;;  %921 = vmatprep.subr.bf16.mxu1 %v920_v44  ;;  %v383_v48 = vpop.f32.mrb[10].mxu0  ;;  %915 = vmatpush1.bf16.msra.mxu0 %v914_v31 }
 0x102   :  { %v971_v49 = vpop.eup %970  ;;  %984 = vtanh.f32 %v380_v42  ;;  %v384_v50 = vadd.f32 %v383_v48, %v1344_v60  ;;  %v472_v51 = vpop.f32.mrb[10].mxu1  ;;  %923 = vmatpush1.bf16.msra.mxu1 %v922_v34 }
 0x103   :  { %v385_v53 = vpop.f32.mrb[11].mxu0  ;;  %v973_v54 = vpop.eup %972  ;;  %986 = vtanh.f32 %v469_v46  ;;  %v473_v55 = vadd.f32 %v472_v51, %v1344_v60 }
 0x104   :  { %v386_v56 = vadd.f32 %v385_v53, %v1344_v60  ;;  %v474_v52 = vpop.f32.mrb[11].mxu1  ;;  %v975_v57 = vpop.eup %974  ;;  %988 = vtanh.f32 %v384_v50  ;;  %v918_v59 = vpack.c.bf16 %v973_v54, %v965_v40 }
 0x105   :  { %v475_v58 = vadd.f32 %v474_v52, %v1344_v60  ;;  %v977_v61 = vpop.eup %976  ;;  %990 = vtanh.f32 %v473_v55  ;;  %v389_v62 = vpop.f32.mrb[12].mxu0  ;;  %v926_v0 = vpack.c.bf16 %v975_v57, %v967_v45 }
 0x106   :  { %v979_v1 = vpop.eup %978  ;;  %992 = vtanh.f32 %v386_v56  ;;  %v390_v2 = vadd.f32 %v389_v62, %v1347_v63  ;;  %v478_v4 = vpop.f32.mrb[12].mxu1  ;;  %v916_v6 = vpack.c.bf16 %v977_v61, %v969_v47 }
 0x107   :  { %v391_v5 = vpop.f32.mrb[13].mxu0  ;;  %994 = vtanh.f32 %v475_v58  ;;  %v479_v7 = vadd.f32 %v478_v4, %v1347_v63  ;;  %v480_v9 = vpop.f32.mrb[13].mxu1  ;;  %v924_v10 = vpack.c.bf16 %v979_v1, %v971_v49 }
 0x108   :  { %v392_v8 = vadd.f32 %v391_v5, %v1347_v63  ;;  %996 = vtanh.f32 %v390_v2  ;;  %v481_v60 = vadd.f32 %v480_v9, %v1347_v63  ;;  %917 = vmatprep.subr.bf16.mxu0 %v916_v6  ;;  %v526_v42 = vpop.permute.xlu0 %525 }
 0x109   :  { %998 = vtanh.f32 %v479_v7  ;;  %925 = vmatprep.subr.bf16.mxu1 %v924_v10  ;;  %v395_v11 = vpop.f32.mrb[14].mxu0  ;;  %919 = vmatpush1.bf16.msra.mxu0 %v918_v59 }
 0x10a   :  { %v981_v13 = vpop.eup %980  ;;  %1000 = vtanh.f32 %v392_v8  ;;  %v396_v14 = vadd.f32 %v395_v11, %v1356_v15  ;;  %v484_v16 = vpop.f32.mrb[14].mxu1  ;;  %927 = vmatpush1.bf16.msra.mxu1 %v926_v0 }
 0x10b   :  { %v397_v17 = vpop.f32.mrb[15].mxu0  ;;  %v983_v18 = vpop.eup %982  ;;  %1002 = vtanh.f32 %v481_v60  ;;  %v485_v63 = vadd.f32 %v484_v16, %v1356_v15 }
 0x10c   :  { %v398_v19 = vadd.f32 %v397_v17, %v1356_v15  ;;  %v486_v20 = vpop.f32.mrb[15].mxu1  ;;  %v985_v21 = vpop.eup %984  ;;  %1004 = vtanh.f32 %v396_v14  ;;  %844 = vmatmul.mubr.msk.f32.vlgmr.msra.gmra.mrb[16].mxu0 %vm528_vm1, %v521_v12 }
 0x10d   :  { %v487_v22 = vadd.f32 %v486_v20, %v1356_v15  ;;  %v987_v23 = vpop.eup %986  ;;  %1006 = vtanh.f32 %v485_v63  ;;  %845 = vmatmul.mubr.msk.f32.vlgmr.msra.gmra.mrb[16].mxu1 %vm528_vm1, %v521_v12  ;;  %738 = vmatprep.mubr.f32.mxu0 %v1012_v3 }
 0x10e   :  { %v989_v24 = vpop.eup %988  ;;  %1008 = vtanh.f32 %v398_v19  ;;  %809 = vmatprep.mubr.f32.mxu1 %v1012_v3 }
 0x10f   :  { %v991_v25 = vpop.eup %990  ;;  %1010 = vtanh.f32 %v487_v22  ;;  %v930_v26 = vpack.c.bf16 %v989_v24, %v981_v13 }
 0x110   :  { %v993_v27 = vpop.eup %992  ;;  %v938_v28 = vpack.c.bf16 %v991_v25, %v983_v18 }
 0x111   :  { %v995_v29 = vpop.eup %994  ;;  %v928_v30 = vpack.c.bf16 %v993_v27, %v985_v21 }
 0x112   :  { %v997_v15 = vpop.eup %996  ;;  %v936_v31 = vpack.c.bf16 %v995_v29, %v987_v23 }
 0x113   :  { %v999_v32 = vpop.eup %998  ;;  %929 = vmatprep.subr.bf16.mxu0 %v928_v30 }
 0x114   :  { %v1001_v33 = vpop.eup %1000  ;;  %937 = vmatprep.subr.bf16.mxu1 %v936_v31  ;;  %931 = vmatpush1.bf16.msra.mxu0 %v930_v26 }
 0x115   :  { %v1003_v34 = vpop.eup %1002  ;;  %939 = vmatpush1.bf16.msra.mxu1 %v938_v28 }
 0x116   :  { %v1005_v35 = vpop.eup %1004 }
 0x117   :  { %v1007_v36 = vpop.eup %1006  ;;  %v934_v37 = vpack.c.bf16 %v1005_v35, %v997_v15 }
 0x118   :  { %v1009_v3 = vpop.eup %1008  ;;  %v942_v38 = vpack.c.bf16 %v1007_v36, %v999_v32 }
 0x119   :  { %v1011_v39 = vpop.eup %1010  ;;  %v932_v40 = vpack.c.bf16 %v1009_v3, %v1001_v33 }
 0x11a   :  { %v940_v41 = vpack.c.bf16 %v1011_v39, %v1003_v34 }
 0x11b   :  { %933 = vmatprep.subr.bf16.mxu0 %v932_v40 }
 0x11c   :  { %941 = vmatprep.subr.bf16.mxu1 %v940_v41  ;;  %935 = vmatpush1.bf16.msra.mxu0 %v934_v37 }
 0x11d   :  { %943 = vmatpush1.bf16.msra.mxu1 %v942_v38 }
 0x11f   :  { %846 = vmatmul.mubr.msk.f32.vlgmr.msra.gmra.mrb[18].mxu0 %vm528_vm1, %v521_v12 }
 0x120   :  { %847 = vmatmul.mubr.msk.f32.vlgmr.msra.gmra.mrb[18].mxu1 %vm528_vm1, %v521_v12 }
 0x1df   :  { %v598_v43 = vpop.f32.mrb[16].mxu0 }
 0x1e0   :  { %v599_v44 = vadd.f32 %v598_v43, %v526_v42  ;;  %v669_v45 = vpop.f32.mrb[16].mxu1  ;;  %v600_v46 = vpop.f32.mrb[17].mxu0 }
 0x1e1   :  { %v670_v47 = vadd.f32 %v669_v45, %v526_v42  ;;  %v601_v48 = vadd.f32 %v600_v46, %v526_v42  ;;  %v671_v49 = vpop.f32.mrb[17].mxu1 }
 0x1e2   :  { %816 = vst [vmem:[%s1417_s5] sm:$0xff] %v599_v44  ;;  %v672_v50 = vadd.f32 %v671_v49, %v526_v42 }
 0x1e3   :  { %818 = vst [vmem:[%s1417_s5 + $0x10] sm:$0xff] %v670_v47  ;;  %817 = vst [vmem:[%s1417_s5 + $0x8] sm:$0xff] %v601_v48 }
 0x1e4   :  { %819 = vst [vmem:[%s1417_s5 + $0x18] sm:$0xff] %v672_v50 }
 0x1f2   :  { %v740_v51 = vpop.f32.mrb[18].mxu0 }
 0x1f3   :  { %v741_v53 = vadd.f32 %v740_v51, %v526_v42  ;;  %v811_v54 = vpop.f32.mrb[18].mxu1  ;;  %v742_v55 = vpop.f32.mrb[19].mxu0 }
 0x1f4   :  { %v812_v56 = vadd.f32 %v811_v54, %v526_v42  ;;  %v743_v52 = vadd.f32 %v742_v55, %v526_v42  ;;  %v813_v57 = vpop.f32.mrb[19].mxu1 }
 0x1f5   :  { %820 = vst [vmem:[%s1417_s5 + $0x20] sm:$0xff] %v741_v53  ;;  %v814_v58 = vadd.f32 %v813_v57, %v526_v42 }
 0x1f6   :  { %822 = vst [vmem:[%s1417_s5 + $0x30] sm:$0xff] %v812_v56  ;;  %821 = vst [vmem:[%s1417_s5 + $0x28] sm:$0xff] %v743_v52 }
 0x1f7   :  { %823 = vst [vmem:[%s1417_s5 + $0x38] sm:$0xff] %v814_v58 }

</bundles_post_ra>
